<compile_context>
chip_gen: v7x
topology: tpu7x:2x2x1
jax: 0.10.0
libtpu: 0.0.40
codegen_flags: <defaults>
</compile_context>

<pallas_src>
import jax
import jax.numpy as jnp
from jax import lax
from jax.experimental import pallas as pl
from jax.experimental.pallas import tpu as pltpu


_H_CHUNK = 128  # epilogue chunk along the (padded) hidden dim


# ----------------------------- Pallas kernel --------------------------------

def explainer_kernel(ef_ref, w1t_ref, w2_ref, b2_ref, out_ref):
    # ef_ref : [Kp, TE]  bf16  edge features (edges on lanes) + ones bias row
    # w1t_ref: [Hp, Kp]  bf16  emb_linear1 weight^T with cond_act and b1 folded
    # w2_ref : [Hp, 1]   f32   emb_linear2 weight (zero-padded over H)
    # b2_ref : [1, 1]    f32   emb_linear2 bias
    # out_ref: [1, TE]   f32   sigmoid(log_alpha)  (lane-dense)
    x = ef_ref[...]                                   # [Kp, TE] bf16
    hp = w1t_ref.shape[0]
    te = x.shape[1]
    n_chunks = hp // _H_CHUNK                         # static

    def chunk_body(c, y):
        r = pl.multiple_of(c * _H_CHUNK, _H_CHUNK)
        # emb_linear1 chunk: MXU matmul with f32 accumulation (bias folded in).
        h = jnp.dot(w1t_ref[pl.ds(r, _H_CHUNK), :], x,
                    preferred_element_type=jnp.float32)          # [HC, TE]
        h = jnp.maximum(h, 0.0)                                  # ReLU
        # emb_linear2 (H -> 1): VPU multiply + sublane reduction, chunk-wise
        # accumulated so the full [Hp, TE] f32 slab is never materialized.
        return y + jnp.sum(h * w2_ref[pl.ds(r, _H_CHUNK), :],
                           axis=0, keepdims=True)                # [1, TE]

    y = lax.fori_loop(0, n_chunks, chunk_body,
                      jnp.zeros((1, te), jnp.float32), unroll=True)

    # concrete_sample(log_alpha, training=False) == sigmoid(log_alpha)
    out_ref[...] = jax.nn.sigmoid(y + b2_ref[...])


# ----------------------------- kernel wrapper --------------------------------

def _pick_tile_e(num_edges, tile_e):
    """Clamp tile_e: lane tiles are multiples of 128; keep >=2 grid steps when
    E allows (v7x has 2 TensorCores sharding the 'parallel' axis)."""
    half_rounded = (((max(num_edges, 1) + 1) // 2) + 127) // 128 * 128
    return max(128, min(tile_e, half_rounded))


def explainer_forward(edge_feat_t, w1t, w2, b2, *, tile_e=2048):
    """Explainer MLP + sigmoid on all edges.

    edge_feat_t: [Kp, E] bf16, edges on the lane axis (row 2D is the bias row).
    w1t:         [Hp, Kp] bf16, cond_act & b1 folded in.
    w2:          [Hp, 1] f32 (zero-padded), b2: [1, 1] f32.
    Returns [E] f32.
    """
    kp, num_edges = edge_feat_t.shape
    hp = w1t.shape[0]
    tile_e = _pick_tile_e(num_edges, tile_e)
    grid_e = pl.cdiv(num_edges, tile_e)

    # Explicit VMEM budget (review: set it when enlarging tiles; v7x has only
    # 64 MiB physical VMEM per TC).  Our footprint per step:
    vmem_need = (2 * kp * tile_e * 2        # double-buffered bf16 edge slab
                 + 2 * tile_e * 4           # double-buffered f32 output row
                 + hp * kp * 2 + hp * 4 + 4  # resident weights
                 + _H_CHUNK * tile_e * 4    # per-chunk f32 h
                 + tile_e * 4)              # y accumulator
    vmem_limit = int(min(48 * 1024 * 1024, max(32 * 1024 * 1024, 2 * vmem_need)))

    out = pl.pallas_call(
        explainer_kernel,
        out_shape=jax.ShapeDtypeStruct((1, num_edges), jnp.float32),
        grid_spec=pltpu.PrefetchScalarGridSpec(
            num_scalar_prefetch=0,
            grid=(grid_e,),
            in_specs=[
                pl.BlockSpec((kp, tile_e), lambda i: (0, i)),  # edge slab
                pl.BlockSpec(w1t.shape, lambda i: (0, 0)),     # W1' (resident)
                pl.BlockSpec(w2.shape, lambda i: (0, 0)),      # W2  (resident)
                pl.BlockSpec(b2.shape, lambda i: (0, 0)),      # b2  (resident)
            ],
            out_specs=pl.BlockSpec((1, tile_e), lambda i: (0, i)),
        ),
        compiler_params=pltpu.CompilerParams(
            dimension_semantics=("parallel",),   # shards edge tiles on v7x's 2 TCs
            vmem_limit_bytes=vmem_limit),
    )(edge_feat_t, w1t, w2, b2)
    return out[0]


# ------------------------------ JAX glue -------------------------------------

def uniform_linear(key, fan_in, fan_out):
    """PyTorch-style nn.Linear init, stored as [in, out] / [1, out]."""
    kw, kb = jax.random.split(key)
    bound = 1.0 / jnp.sqrt(fan_in)
    w = jax.random.uniform(kw, (fan_in, fan_out), jnp.float32, -bound, bound)
    b = jax.random.uniform(kb, (1, fan_out), jnp.float32, -bound, bound)
    return w, b


def tag_explainer_forward(x, edge_index, gnn_params, mlp_params, exp_params,
                          *, tile_e=2048):
    """Mirror of TAGExplainer.forward(data, mlp_explainer) for one graph."""
    Wg, bg = gnn_params
    Wm, bm = mlp_params
    wc, bc, w1, b1, w2, b2 = exp_params

    # TODO(synk): self.model / mlp_explainer are external nn.Modules; they are
    # stubbed here with deterministic single-layer maps (same shapes/semantics
    # for the downstream explain() path).
    node_embed = jnp.maximum(x @ Wg + bg, 0.0)                  # [N, D]
    graph_embed = jnp.mean(node_embed, axis=0, keepdims=True)   # [1, D]
    condition = jnp.maximum(graph_embed @ Wm + bm, 0.0)         # [1, D]  (grads)

    # Grid-invariant cond_proj branch, hoisted and folded into W1 in f32.
    cond_act = jnp.maximum(condition @ wc + bc, 0.0)            # [1, 2D]

    D = node_embed.shape[1]
    two_d = 2 * D
    H = w1.shape[1]
    HP = pl.cdiv(H, _H_CHUNK) * _H_CHUNK                        # 600 -> 640
    KP = ((two_d + 1 + 15) // 16) * 16                          # +bias row, bf16 pack

    # W1'(k,h) = W1(k,h) * cond_act(k); bias b1 appended as an extra K row.
    w1_scaled = w1 * cond_act.reshape(-1, 1)                    # [2D, H] f32
    w1_aug = jnp.concatenate([w1_scaled, b1], axis=0)           # [2D+1, H]
    w1_aug = jnp.pad(w1_aug, ((0, KP - (two_d + 1)), (0, HP - H)))
    w1t = w1_aug.T.astype(jnp.bfloat16)                         # [HP, KP]
    w2p = jnp.pad(w2, ((0, HP - H), (0, 0)))                    # [HP, 1] f32

    # explain(): gather edge endpoint embeddings; edges on the lane axis; a
    # constant-ones row carries the folded b1.
    # TODO(synk): for very large E, fuse this gather into the kernel via
    # scalar-prefetched edge_index + node_embed resident in VMEM instead of
    # materializing the [KP, E] feature slab in HBM.
    col, row = edge_index[0], edge_index[1]
    num_edges = col.shape[0]
    ne_t = node_embed.T                                          # [D, N]
    ones_row = jnp.ones((1, num_edges), node_embed.dtype)
    zero_rows = jnp.zeros((KP - two_d - 1, num_edges), node_embed.dtype)
    f12_t = jnp.concatenate([ne_t[:, col], ne_t[:, row], ones_row, zero_rows],
                            axis=0).astype(jnp.bfloat16)        # [KP, E]

    # Explainer MLP + concrete_sample (training=False) -- Pallas kernel.
    values = explainer_forward(f12_t, w1t, w2p, b2, tile_e=tile_e)  # [E]

    # sparse_coo_tensor(...).to_dense(); symmetrize; re-gather edge mask.
    N = node_embed.shape[0]
    dense = jnp.zeros((N, N), jnp.float32).at[col, row].add(values)
    sym = (dense + dense.T) * 0.5
    edge_mask = sym[col, row]                                    # [E]
    return edge_mask


def ref_tag_explainer_forward(x, edge_index, gnn_params, mlp_params, exp_params):
    """Pure-JAX f32 reference of the same forward pass."""
    Wg, bg = gnn_params
    Wm, bm = mlp_params
    wc, bc, w1, b1, w2, b2 = exp_params
    node_embed = jnp.maximum(x @ Wg + bg, 0.0)
    graph_embed = jnp.mean(node_embed, axis=0, keepdims=True)
    condition = jnp.maximum(graph_embed @ Wm + bm, 0.0)
    cond_act = jnp.maximum(condition @ wc + bc, 0.0)
    col, row = edge_index[0], edge_index[1]
    f12 = jnp.concatenate([node_embed[col], node_embed[row]], axis=-1)
    h = jnp.maximum((f12 * cond_act) @ w1 + b1, 0.0)
    values = jax.nn.sigmoid((h @ w2 + b2).reshape(-1))
    N = node_embed.shape[0]
    dense = jnp.zeros((N, N), jnp.float32).at[col, row].add(values)
    sym = (dense + dense.T) * 0.5
    return sym[col, row]


# ------------------------------ main -----------------------------------------

if __name__ == "__main__":
    N, F_in, D, E, H = 16, 8, 32, 32, 600   # nodes, feats, embed_dim, edges, hidden
    key = jax.random.PRNGKey(0)
    k = jax.random.split(key, 8)

    # inputs (a small synthetic graph)
    x = jax.random.normal(k[0], (N, F_in), jnp.float32)
    edge_index = jax.random.randint(k[1], (2, E), 0, N)

    # stub GNN model + downstream mlp_explainer parameters
    gnn_params = uniform_linear(k[2], F_in, D)       # node embedder
    mlp_params = uniform_linear(k[3], D, D)          # mlp_explainer(mode='explain')

    # Explainer (graph_level=True): embed_dims = 2*D, cond_dims = D, hidden = H
    wc, bc = uniform_linear(k[4], D, 2 * D)          # cond_proj
    w1, b1 = uniform_linear(k[5], 2 * D, H)          # emb_linear1
    w2, b2 = uniform_linear(k[6], H, 1)              # emb_linear2
    exp_params = (wc, bc, w1, b1, w2, b2)

    edge_mask = tag_explainer_forward(x, edge_index, gnn_params,
                                      mlp_params, exp_params)
    edge_mask = jax.block_until_ready(edge_mask)

    ref_mask = ref_tag_explainer_forward(x, edge_index, gnn_params,
                                         mlp_params, exp_params)

    assert edge_mask.shape == (E,)
    assert bool(jnp.all(jnp.isfinite(edge_mask)))
    assert bool(jnp.all((edge_mask >= 0.0) & (edge_mask <= 1.0)))
    assert bool(jnp.allclose(edge_mask, ref_mask, atol=2e-2, rtol=2e-2))
    print("KERNEL_OK")
</pallas_src>

<mosaic_0001>
module attributes {stable_mosaic.version = 11 : i64} {
  func.func @explainer_kernel(%arg0: i32, %arg1: memref<80x128xbf16, #tpu.memory_space<vmem>>, %arg2: memref<640x80xbf16, #tpu.memory_space<vmem>>, %arg3: memref<640x1xf32, #tpu.memory_space<vmem>>, %arg4: memref<1x1xf32, #tpu.memory_space<vmem>>, %arg5: memref<1x128xf32, #tpu.memory_space<vmem>>) attributes {dimension_semantics = [#tpu.dimension_semantics<parallel>], iteration_bounds = array<i64: 1>, scalar_prefetch = 0 : i64, scratch_operands = 0 : i64, tpu.core_type = #tpu.core_type<tc>, window_params = [{transform_indices = @transform_0, window_bounds = array<i64: 80, 128>}, {pipeline_mode = #tpu.pipeline_mode<synchronous>, transform_indices = @transform_1, window_bounds = array<i64: 640, 80>}, {pipeline_mode = #tpu.pipeline_mode<synchronous>, transform_indices = @transform_2, window_bounds = array<i64: 640, 1>}, {pipeline_mode = #tpu.pipeline_mode<synchronous>, transform_indices = @transform_3, window_bounds = array<i64: 1, 1>}, {transform_indices = @transform_4, window_bounds = array<i64: 1, 128>}]} {
    %c0 = arith.constant 0 : index
    %c0_0 = arith.constant 0 : index
    %0 = vector.load %arg1[%c0, %c0_0] : memref<80x128xbf16, #tpu.memory_space<vmem>>, vector<80x128xbf16>
    %cst = arith.constant 0.000000e+00 : f32
    %1 = vector.broadcast %cst : f32 to vector<1x128xf32>
    %c0_i32 = arith.constant 0 : i32
    %c128_i32 = arith.constant 128 : i32
    %2 = arith.muli %c0_i32, %c128_i32 : i32
    %3 = tpu.assume_multiple %2, 128 : i32
    %4 = arith.index_cast %3 : i32 to index
    %c0_1 = arith.constant 0 : index
    %5 = vector.load %arg2[%4, %c0_1] : memref<640x80xbf16, #tpu.memory_space<vmem>>, vector<128x80xbf16>
    %cst_2 = arith.constant dense<0.000000e+00> : vector<128x128xf32>
    %6 = tpu.matmul %5, %0, %cst_2 {dimension_numbers = #tpu.dot_dimension_numbers<[1], [0], [0], [1], [0, 0, 1, 1], [], []>} : vector<128x80xbf16>, vector<80x128xbf16>, vector<128x128xf32> -> vector<128x128xf32>
    %cst_3 = arith.constant 0.000000e+00 : f32
    %7 = vector.broadcast %cst_3 : f32 to vector<128x128xf32>
    %8 = arith.maximumf %6, %7 : vector<128x128xf32>
    %9 = arith.index_cast %3 : i32 to index
    %c0_4 = arith.constant 0 : index
    %10 = vector.load %arg3[%9, %c0_4] : memref<640x1xf32, #tpu.memory_space<vmem>>, vector<128x1xf32>
    %11 = vector.broadcast %10 : vector<128x1xf32> to vector<128x128xf32>
    %12 = arith.mulf %8, %11 : vector<128x128xf32>
    %cst_5 = arith.constant dense<0.000000e+00> : vector<128xf32>
    %13 = vector.multi_reduction <add>, %12, %cst_5 [0] : vector<128x128xf32> to vector<128xf32>
    %14 = vector.shape_cast %13 : vector<128xf32> to vector<1x128xf32>
    %15 = arith.addf %1, %14 : vector<1x128xf32>
    %c1_i32 = arith.constant 1 : i32
    %c128_i32_6 = arith.constant 128 : i32
    %16 = arith.muli %c1_i32, %c128_i32_6 : i32
    %17 = tpu.assume_multiple %16, 128 : i32
    %18 = arith.index_cast %17 : i32 to index
    %c0_7 = arith.constant 0 : index
    %19 = vector.load %arg2[%18, %c0_7] : memref<640x80xbf16, #tpu.memory_space<vmem>>, vector<128x80xbf16>
    %cst_8 = arith.constant dense<0.000000e+00> : vector<128x128xf32>
    %20 = tpu.matmul %19, %0, %cst_8 {dimension_numbers = #tpu.dot_dimension_numbers<[1], [0], [0], [1], [0, 0, 1, 1], [], []>} : vector<128x80xbf16>, vector<80x128xbf16>, vector<128x128xf32> -> vector<128x128xf32>
    %cst_9 = arith.constant 0.000000e+00 : f32
    %21 = vector.broadcast %cst_9 : f32 to vector<128x128xf32>
    %22 = arith.maximumf %20, %21 : vector<128x128xf32>
    %23 = arith.index_cast %17 : i32 to index
    %c0_10 = arith.constant 0 : index
    %24 = vector.load %arg3[%23, %c0_10] : memref<640x1xf32, #tpu.memory_space<vmem>>, vector<128x1xf32>
    %25 = vector.broadcast %24 : vector<128x1xf32> to vector<128x128xf32>
    %26 = arith.mulf %22, %25 : vector<128x128xf32>
    %cst_11 = arith.constant dense<0.000000e+00> : vector<128xf32>
    %27 = vector.multi_reduction <add>, %26, %cst_11 [0] : vector<128x128xf32> to vector<128xf32>
    %28 = vector.shape_cast %27 : vector<128xf32> to vector<1x128xf32>
    %29 = arith.addf %15, %28 : vector<1x128xf32>
    %c2_i32 = arith.constant 2 : i32
    %c128_i32_12 = arith.constant 128 : i32
    %30 = arith.muli %c2_i32, %c128_i32_12 : i32
    %31 = tpu.assume_multiple %30, 128 : i32
    %32 = arith.index_cast %31 : i32 to index
    %c0_13 = arith.constant 0 : index
    %33 = vector.load %arg2[%32, %c0_13] : memref<640x80xbf16, #tpu.memory_space<vmem>>, vector<128x80xbf16>
    %cst_14 = arith.constant dense<0.000000e+00> : vector<128x128xf32>
    %34 = tpu.matmul %33, %0, %cst_14 {dimension_numbers = #tpu.dot_dimension_numbers<[1], [0], [0], [1], [0, 0, 1, 1], [], []>} : vector<128x80xbf16>, vector<80x128xbf16>, vector<128x128xf32> -> vector<128x128xf32>
    %cst_15 = arith.constant 0.000000e+00 : f32
    %35 = vector.broadcast %cst_15 : f32 to vector<128x128xf32>
    %36 = arith.maximumf %34, %35 : vector<128x128xf32>
    %37 = arith.index_cast %31 : i32 to index
    %c0_16 = arith.constant 0 : index
    %38 = vector.load %arg3[%37, %c0_16] : memref<640x1xf32, #tpu.memory_space<vmem>>, vector<128x1xf32>
    %39 = vector.broadcast %38 : vector<128x1xf32> to vector<128x128xf32>
    %40 = arith.mulf %36, %39 : vector<128x128xf32>
    %cst_17 = arith.constant dense<0.000000e+00> : vector<128xf32>
    %41 = vector.multi_reduction <add>, %40, %cst_17 [0] : vector<128x128xf32> to vector<128xf32>
    %42 = vector.shape_cast %41 : vector<128xf32> to vector<1x128xf32>
    %43 = arith.addf %29, %42 : vector<1x128xf32>
    %c3_i32 = arith.constant 3 : i32
    %c128_i32_18 = arith.constant 128 : i32
    %44 = arith.muli %c3_i32, %c128_i32_18 : i32
    %45 = tpu.assume_multiple %44, 128 : i32
    %46 = arith.index_cast %45 : i32 to index
    %c0_19 = arith.constant 0 : index
    %47 = vector.load %arg2[%46, %c0_19] : memref<640x80xbf16, #tpu.memory_space<vmem>>, vector<128x80xbf16>
    %cst_20 = arith.constant dense<0.000000e+00> : vector<128x128xf32>
    %48 = tpu.matmul %47, %0, %cst_20 {dimension_numbers = #tpu.dot_dimension_numbers<[1], [0], [0], [1], [0, 0, 1, 1], [], []>} : vector<128x80xbf16>, vector<80x128xbf16>, vector<128x128xf32> -> vector<128x128xf32>
    %cst_21 = arith.constant 0.000000e+00 : f32
    %49 = vector.broadcast %cst_21 : f32 to vector<128x128xf32>
    %50 = arith.maximumf %48, %49 : vector<128x128xf32>
    %51 = arith.index_cast %45 : i32 to index
    %c0_22 = arith.constant 0 : index
    %52 = vector.load %arg3[%51, %c0_22] : memref<640x1xf32, #tpu.memory_space<vmem>>, vector<128x1xf32>
    %53 = vector.broadcast %52 : vector<128x1xf32> to vector<128x128xf32>
    %54 = arith.mulf %50, %53 : vector<128x128xf32>
    %cst_23 = arith.constant dense<0.000000e+00> : vector<128xf32>
    %55 = vector.multi_reduction <add>, %54, %cst_23 [0] : vector<128x128xf32> to vector<128xf32>
    %56 = vector.shape_cast %55 : vector<128xf32> to vector<1x128xf32>
    %57 = arith.addf %43, %56 : vector<1x128xf32>
    %c4_i32 = arith.constant 4 : i32
    %c128_i32_24 = arith.constant 128 : i32
    %58 = arith.muli %c4_i32, %c128_i32_24 : i32
    %59 = tpu.assume_multiple %58, 128 : i32
    %60 = arith.index_cast %59 : i32 to index
    %c0_25 = arith.constant 0 : index
    %61 = vector.load %arg2[%60, %c0_25] : memref<640x80xbf16, #tpu.memory_space<vmem>>, vector<128x80xbf16>
    %cst_26 = arith.constant dense<0.000000e+00> : vector<128x128xf32>
    %62 = tpu.matmul %61, %0, %cst_26 {dimension_numbers = #tpu.dot_dimension_numbers<[1], [0], [0], [1], [0, 0, 1, 1], [], []>} : vector<128x80xbf16>, vector<80x128xbf16>, vector<128x128xf32> -> vector<128x128xf32>
    %cst_27 = arith.constant 0.000000e+00 : f32
    %63 = vector.broadcast %cst_27 : f32 to vector<128x128xf32>
    %64 = arith.maximumf %62, %63 : vector<128x128xf32>
    %65 = arith.index_cast %59 : i32 to index
    %c0_28 = arith.constant 0 : index
    %66 = vector.load %arg3[%65, %c0_28] : memref<640x1xf32, #tpu.memory_space<vmem>>, vector<128x1xf32>
    %67 = vector.broadcast %66 : vector<128x1xf32> to vector<128x128xf32>
    %68 = arith.mulf %64, %67 : vector<128x128xf32>
    %cst_29 = arith.constant dense<0.000000e+00> : vector<128xf32>
    %69 = vector.multi_reduction <add>, %68, %cst_29 [0] : vector<128x128xf32> to vector<128xf32>
    %70 = vector.shape_cast %69 : vector<128xf32> to vector<1x128xf32>
    %71 = arith.addf %57, %70 : vector<1x128xf32>
    %c5_i32 = arith.constant 5 : i32
    %c0_30 = arith.constant 0 : index
    %c0_31 = arith.constant 0 : index
    %72 = vector.load %arg4[%c0_30, %c0_31] : memref<1x1xf32, #tpu.memory_space<vmem>>, vector<1x1xf32>
    %73 = vector.broadcast %72 : vector<1x1xf32> to vector<1x128xf32>
    %74 = arith.addf %71, %73 : vector<1x128xf32>
    %75 = arith.negf %74 : vector<1x128xf32>
    %76 = math.exp %75 : vector<1x128xf32>
    %cst_32 = arith.constant 1.000000e+00 : f32
    %77 = vector.broadcast %cst_32 : f32 to vector<1x128xf32>
    %78 = arith.addf %77, %76 : vector<1x128xf32>
    %79 = arith.divf %77, %78 : vector<1x128xf32>
    %c0_33 = arith.constant 0 : index
    %c0_34 = arith.constant 0 : index
    %80 = vector.load %arg5[%c0_33, %c0_34] : memref<1x128xf32, #tpu.memory_space<vmem>>, vector<1x128xf32>
    tpu.vector_store %arg5[%c0_33, %c0_34], %79 {strides = array<i32>} : memref<1x128xf32, #tpu.memory_space<vmem>>, vector<1x128xf32>,
    return
  }
  func.func @transform_0(%arg0: i32) -> (i32, i32) {
    %c0_i32 = arith.constant 0 : i32
    %c0_i32_0 = arith.constant 0 : i32
    return %c0_i32, %arg0 : i32, i32
  }
  func.func @transform_1(%arg0: i32) -> (i32, i32) {
    %c0_i32 = arith.constant 0 : i32
    %c0_i32_0 = arith.constant 0 : i32
    %c0_i32_1 = arith.constant 0 : i32
    return %c0_i32, %c0_i32_0 : i32, i32
  }
  func.func @transform_2(%arg0: i32) -> (i32, i32) {
    %c0_i32 = arith.constant 0 : i32
    %c0_i32_0 = arith.constant 0 : i32
    %c0_i32_1 = arith.constant 0 : i32
    return %c0_i32, %c0_i32_0 : i32, i32
  }
  func.func @transform_3(%arg0: i32) -> (i32, i32) {
    %c0_i32 = arith.constant 0 : i32
    %c0_i32_0 = arith.constant 0 : i32
    %c0_i32_1 = arith.constant 0 : i32
    return %c0_i32, %c0_i32_0 : i32, i32
  }
  func.func @transform_4(%arg0: i32) -> (i32, i32) {
    %c0_i32 = arith.constant 0 : i32
    %c0_i32_0 = arith.constant 0 : i32
    return %c0_i32, %arg0 : i32, i32
  }
}

</mosaic_0001>

<bundles_post_ra>
// kernel: tpu_custom_call.1
= control target key start
LH: loop header
LB: loop body
LE: loop exit
PB: predicated region body
PF: predicated region fallthrough
CT: control target
= control target key end

     0   :  { %s2979_s0 = inlined_call_operand.vmem [shape: bf16[80,32], index: 0, kind: input, shape index: {}]   ;;  %s2980_s1 = inlined_call_operand.vmem [shape: bf16[640,80], index: 1, kind: input, shape index: {}]   ;;  %s2981_s2 = inlined_call_operand.vmem [shape: f32[640,1], index: 2, kind: input, shape index: {}]   ;;  %s2982_s3 = inlined_call_operand.<no memory space> [shape: f32[1,1], index: 3, kind: input, shape index: {}]   ;;  %s2983_s4 = inlined_call_operand.hbm [shape: f32[1,32], index: 4, kind: output, shape index: {}]  }
   0x1   :  { %v9_v0 = vstv %s2982_s3 }
   0x2   :  { %10 = vst [vmem:[#allocation2] sm:$0x1] %v9_v0 }
   0x3   :  { %v257_v1 = vld [vmem:[%s2981_s2 + $0x10] sm:$0xff]  ;;  %v255_v2 = vld [vmem:[%s2981_s2] sm:$0xff]  ;;  %v2233_v3 = vmov 0   ;;  %v258_v5 = vld [vmem:[%s2981_s2 + $0x18] sm:$0xff]  ;;  %vm117_vm0 = vcmask 654336  }
   0x4   :  { %2159 = vset.pattern.permute.xlu1 %v2233_v3  ;;  %2158 = vset.pattern.permute.xlu0 %v2233_v3  ;;  %v2272_v4 = vld [vmem:[%s2979_s0] sm:$0xff]   ;;  %v256_v6 = vld [vmem:[%s2981_s2 + $0x8] sm:$0xff]  ;;  %v2294_v8 = vld [vmem:[%s2979_s0 + $0x10] sm:$0xff]  }
   0x5   :  { %283 = vperm.xlu1 %2159, %v257_v1   ;;  %273 = vperm.xlu0 %2158, %v255_v2   ;;  %v2285_v7 = vld [vmem:[%s2979_s0 + $0x8] sm:$0xff]   ;;  %v259_v10 = vld [vmem:[%s2981_s2 + $0x20] sm:$0xff]  ;;  %v2307_v11 = vld [vmem:[%s2979_s0 + $0x18] sm:$0xff]  }
   0x6   :  { %2016 = vmatprep.subr.bf16.mxu0 %v2272_v4  ;;  %2042 = vmatprep.subr.bf16.mxu1 %v2272_v4  ;;  %v260_v9 = vld [vmem:[%s2981_s2 + $0x28] sm:$0xff]  ;;  %v262_v12 = vld [vmem:[%s2981_s2 + $0x38] sm:$0xff]  ;;  %v2165_v13 = vld [vmem:[%s2980_s1] sm:$0xff]  }
   0x7   :  { %2017 = vmatpush3.bf16.msra.mxu0 %v2272_v4  ;;  %2043 = vmatpush3.bf16.msra.mxu1 %v2272_v4  ;;  %v261_v14 = vld [vmem:[%s2981_s2 + $0x30] sm:$0xff]  ;;  %v2166_v15 = vld [vmem:[%s2980_s1 + $0x40] sm:$0xff]   ;;  %v264_v17 = vld [vmem:[%s2981_s2 + $0x48] sm:$0xff] }
   0x8   :  { %2018 = vmatprep.subr.bf16.mxu0 %v2285_v7  ;;  %2044 = vmatprep.subr.bf16.mxu1 %v2285_v7  ;;  %v2331_v16 = vld [vmem:[%s2979_s0 + $0x20] sm:$0xff]   ;;  %v266_v19 = vld [vmem:[%s2981_s2 + $0x58] sm:$0xff]  ;;  %v265_v20 = vld [vmem:[%s2981_s2 + $0x50] sm:$0xff] }
   0x9   :  { %288 = vperm.xlu1 %2159, %v258_v5   ;;  %278 = vperm.xlu0 %2158, %v256_v6   ;;  %v263_v18 = vld [vmem:[%s2981_s2 + $0x40] sm:$0xff]  ;;  %v2167_v21 = vld [vmem:[%s2980_s1 + $0x8] sm:$0xff]   ;;  %v2169_v23 = vld [vmem:[%s2980_s1 + $0x10] sm:$0xff]  }
   0xa   :  { %2026 = vmatprep.mubr.msk.bf16.mxu0 %vm117_vm0, %v2165_v13  ;;  %2052 = vmatprep.mubr.msk.bf16.mxu1 %vm117_vm0, %v2166_v15  ;;  %v2168_v22 = vld [vmem:[%s2980_s1 + $0x48] sm:$0xff]   ;;  %v2170_v24 = vld [vmem:[%s2980_s1 + $0x50] sm:$0xff]   ;;  %v267_v26 = vld [vmem:[%s2981_s2 + $0x60] sm:$0xff] }
   0xb   :  { %2019 = vmatpush3.bf16.msra.mxu0 %v2285_v7  ;;  %2045 = vmatpush3.bf16.msra.mxu1 %v2285_v7  ;;  %v268_v25 = vld [vmem:[%s2981_s2 + $0x68] sm:$0xff]  ;;  %v270_v27 = vld [vmem:[%s2981_s2 + $0x78] sm:$0xff]  ;;  %v269_v28 = vld [vmem:[%s2981_s2 + $0x70] sm:$0xff] }
   0xc   :  { %2020 = vmatprep.subr.bf16.mxu0 %v2294_v8  ;;  %2046 = vmatprep.subr.bf16.mxu1 %v2294_v8  ;;  %v2171_v29 = vld [vmem:[%s2980_s1 + $0x18] sm:$0xff]   ;;  %v2173_v31 = vld [vmem:[%s2980_s1 + $0x20] sm:$0xff]   ;;  %v1791_v33 = vld [vmem:[%s2981_s2 + $0x88] sm:$0xff] }
   0xd   :  { %298 = vperm.xlu1 %2159, %v260_v9   ;;  %293 = vperm.xlu0 %2158, %v259_v10   ;;  %v2172_v30 = vld [vmem:[%s2980_s1 + $0x58] sm:$0xff]   ;;  %v2174_v32 = vld [vmem:[%s2980_s1 + $0x60] sm:$0xff]   ;;  %v1792_v36 = vld [vmem:[%s2981_s2 + $0x90] sm:$0xff] }
   0xe   :  { %v1790_v34 = vld [vmem:[%s2981_s2 + $0x80] sm:$0xff]  ;;  %v1793_v35 = vld [vmem:[%s2981_s2 + $0x98] sm:$0xff]  ;;  %v2175_v37 = vld [vmem:[%s2980_s1 + $0x28] sm:$0xff]  }
   0xf   :  { %2021 = vmatpush3.bf16.msra.mxu0 %v2294_v8  ;;  %2047 = vmatpush3.bf16.msra.mxu1 %v2294_v8  ;;  %v2176_v38 = vld [vmem:[%s2980_s1 + $0x68] sm:$0xff]   ;;  %v2177_v39 = vld [vmem:[%s2980_s1 + $0x30] sm:$0xff]   ;;  %v1794_v42 = vld [vmem:[%s2981_s2 + $0xa0] sm:$0xff] }
  0x10   :  { %2022 = vmatprep.subr.bf16.mxu0 %v2307_v11  ;;  %2048 = vmatprep.subr.bf16.mxu1 %v2307_v11  ;;  %v2178_v40 = vld [vmem:[%s2980_s1 + $0x70] sm:$0xff]   ;;  %v1795_v41 = vld [vmem:[%s2981_s2 + $0xa8] sm:$0xff]  ;;  %v1797_v43 = vld [vmem:[%s2981_s2 + $0xb8] sm:$0xff] }
  0x11   :  { %308 = vperm.xlu1 %2159, %v262_v12   ;;  %303 = vperm.xlu0 %2158, %v261_v14   ;;  %v1796_v44 = vld [vmem:[%s2981_s2 + $0xb0] sm:$0xff]  ;;  %v2179_v45 = vld [vmem:[%s2980_s1 + $0x38] sm:$0xff]   ;;  %v2181_v47 = vld [vmem:[%s2980_s1 + $0x80] sm:$0xff]  }
  0x12   :  { %v2180_v46 = vld [vmem:[%s2980_s1 + $0x78] sm:$0xff]   ;;  %v2182_v48 = vld [vmem:[%s2980_s1 + $0xc0] sm:$0xff]   ;;  %v1799_v49 = vld [vmem:[%s2981_s2 + $0xc8] sm:$0xff] }
  0x13   :  { %2023 = vmatpush3.bf16.msra.mxu0 %v2307_v11  ;;  %2049 = vmatpush3.bf16.msra.mxu1 %v2307_v11  ;;  %v1798_v50 = vld [vmem:[%s2981_s2 + $0xc0] sm:$0xff]  ;;  %v1801_v51 = vld [vmem:[%s2981_s2 + $0xd8] sm:$0xff]  ;;  %v1800_v52 = vld [vmem:[%s2981_s2 + $0xd0] sm:$0xff] }
  0x14   :  { %2024 = vmatprep.subr.bf16.mxu0 %v2331_v16  ;;  %2050 = vmatprep.subr.bf16.mxu1 %v2331_v16  ;;  %v2183_v53 = vld [vmem:[%s2980_s1 + $0x88] sm:$0xff]   ;;  %v2185_v55 = vld [vmem:[%s2980_s1 + $0x90] sm:$0xff]   ;;  %v1802_v58 = vld [vmem:[%s2981_s2 + $0xe0] sm:$0xff] }
  0x15   :  { %318 = vperm.xlu1 %2159, %v264_v17   ;;  %313 = vperm.xlu0 %2158, %v263_v18   ;;  %v2184_v54 = vld [vmem:[%s2980_s1 + $0xc8] sm:$0xff]   ;;  %v2186_v56 = vld [vmem:[%s2980_s1 + $0xd0] sm:$0xff]   ;;  %v1805_v59 = vld [vmem:[%s2981_s2 + $0xf8] sm:$0xff] }
  0x16   :  { %v1803_v57 = vld [vmem:[%s2981_s2 + $0xe8] sm:$0xff]  ;;  %v1804_v60 = vld [vmem:[%s2981_s2 + $0xf0] sm:$0xff]  ;;  %v2187_v61 = vld [vmem:[%s2980_s1 + $0x98] sm:$0xff]  }
  0x17   :  { %2025 = vmatpush3.bf16.msra.mxu0 %v2331_v16  ;;  %2051 = vmatpush3.bf16.msra.mxu1 %v2331_v16  ;;  %v2188_v62 = vld [vmem:[%s2980_s1 + $0xd8] sm:$0xff]   ;;  %v2189_v63 = vld [vmem:[%s2980_s1 + $0xa0] sm:$0xff]   ;;  %v1839_v1 = vld [vmem:[%s2981_s2 + $0x108] sm:$0xff] }
  0x18   :  { %2068 = vmatprep.subr.bf16.mxu0 %v2272_v4  ;;  %2094 = vmatprep.subr.bf16.mxu1 %v2272_v4  ;;  %v2190_v0 = vld [vmem:[%s2980_s1 + $0xe0] sm:$0xff]   ;;  %v1841_v3 = vld [vmem:[%s2981_s2 + $0x118] sm:$0xff]  ;;  %v2191_v5 = vld [vmem:[%s2980_s1 + $0xa8] sm:$0xff]  }
  0x19   :  { %328 = vperm.xlu1 %2159, %v266_v19   ;;  %323 = vperm.xlu0 %2158, %v265_v20   ;;  %v1838_v2 = vld [vmem:[%s2981_s2 + $0x100] sm:$0xff]  ;;  %v2192_v6 = vld [vmem:[%s2980_s1 + $0xe8] sm:$0xff]   ;;  %v2194_v9 = vld [vmem:[%s2980_s1 + $0xf0] sm:$0xff]  }
  0x1a   :  { %2027 = vmatmul.mubr.msk.bf16.vlgmr.msra.gmra.mrb[0].mxu0 %vm117_vm0, %v2167_v21  ;;  %2053 = vmatmul.mubr.msk.bf16.vlgmr.msra.gmra.mrb[0].mxu1 %vm117_vm0, %v2168_v22  ;;  %v1843_v10 = vld [vmem:[%s2981_s2 + $0x128] sm:$0xff]  ;;  %v1842_v12 = vld [vmem:[%s2981_s2 + $0x120] sm:$0xff] }
  0x1b   :  { %2069 = vmatpush3.bf16.msra.mxu0 %v2272_v4  ;;  %2030 = vmatprep.mubr.msk.bf16.mxu0 %vm117_vm0, %v2169_v23 }
  0x1c   :  { %2056 = vmatprep.mubr.msk.bf16.mxu1 %vm117_vm0, %v2170_v24  ;;  %2070 = vmatprep.subr.bf16.mxu0 %v2285_v7 }
  0x1d   :  { %338 = vperm.xlu1 %2159, %v268_v25   ;;  %333 = vperm.xlu0 %2158, %v267_v26  }
  0x1e   :  { %2095 = vmatpush3.bf16.msra.mxu1 %v2272_v4 }
  0x1f   :  { %2071 = vmatpush3.bf16.msra.mxu0 %v2285_v7  ;;  %2096 = vmatprep.subr.bf16.mxu1 %v2285_v7 }
  0x20   :  { %2072 = vmatprep.subr.bf16.mxu0 %v2294_v8 }
  0x21   :  { %348 = vperm.xlu1 %2159, %v270_v27   ;;  %343 = vperm.xlu0 %2158, %v269_v28  }
  0x22   :  { %2031 = vmatmul.mubr.msk.bf16.gmra.mrb[4].mxu0 %vm117_vm0, %v2171_v29  ;;  %2057 = vmatmul.mubr.msk.bf16.gmra.mrb[4].mxu1 %vm117_vm0, %v2172_v30 }
  0x23   :  { %2073 = vmatpush3.bf16.msra.mxu0 %v2294_v8  ;;  %2034 = vmatprep.mubr.msk.bf16.mxu0 %vm117_vm0, %v2173_v31 }
  0x24   :  { %2060 = vmatprep.mubr.msk.bf16.mxu1 %vm117_vm0, %v2174_v32  ;;  %2097 = vmatpush3.bf16.msra.mxu1 %v2285_v7 }
  0x25   :  { %607 = vperm.xlu1 %2159, %v1791_v33   ;;  %602 = vperm.xlu0 %2158, %v1790_v34  }
  0x26   :  { %2074 = vmatprep.subr.bf16.mxu0 %v2307_v11  ;;  %2098 = vmatprep.subr.bf16.mxu1 %v2294_v8 }
  0x27   :  { %2075 = vmatpush3.bf16.msra.mxu0 %v2307_v11 }
  0x28   :  { %2099 = vmatpush3.bf16.msra.mxu1 %v2294_v8  ;;  %2076 = vmatprep.subr.bf16.mxu0 %v2331_v16 }
  0x29   :  { %617 = vperm.xlu1 %2159, %v1793_v35   ;;  %612 = vperm.xlu0 %2158, %v1792_v36  }
  0x2a   :  { %2035 = vmatmul.mubr.msk.bf16.gmra.mrb[8].mxu0 %vm117_vm0, %v2175_v37  ;;  %2061 = vmatmul.mubr.msk.bf16.gmra.mrb[8].mxu1 %vm117_vm0, %v2176_v38 }
  0x2b   :  { %2038 = vmatprep.mubr.msk.bf16.mxu0 %vm117_vm0, %v2177_v39  ;;  %2064 = vmatprep.mubr.msk.bf16.mxu1 %vm117_vm0, %v2178_v40 }
  0x2c   :  { %2100 = vmatprep.subr.bf16.mxu1 %v2307_v11  ;;  %2077 = vmatpush3.bf16.msra.mxu0 %v2331_v16 }
  0x2d   :  { %627 = vperm.xlu1 %2159, %v1795_v41   ;;  %622 = vperm.xlu0 %2158, %v1794_v42  }
  0x2e   :  { %2101 = vmatpush3.bf16.msra.mxu1 %v2307_v11  ;;  %2120 = vmatprep.subr.bf16.mxu0 %v2272_v4 }
  0x2f   :  { %2102 = vmatprep.subr.bf16.mxu1 %v2331_v16 }
  0x31   :  { %637 = vperm.xlu1 %2159, %v1797_v43   ;;  %632 = vperm.xlu0 %2158, %v1796_v44  }
  0x32   :  { %2039 = vmatmul.mubr.msk.bf16.gmra.mrb[12].mxu0 %vm117_vm0, %v2179_v45  ;;  %2065 = vmatmul.mubr.msk.bf16.gmra.mrb[12].mxu1 %vm117_vm0, %v2180_v46 }
  0x33   :  { %2103 = vmatpush3.bf16.msra.mxu1 %v2331_v16  ;;  %2078 = vmatprep.mubr.msk.bf16.mxu0 %vm117_vm0, %v2181_v47 }
  0x34   :  { %2104 = vmatprep.mubr.msk.bf16.mxu1 %vm117_vm0, %v2182_v48  ;;  %2146 = vmatprep.subr.bf16.mxu1 %v2272_v4 }
  0x35   :  { %647 = vperm.xlu1 %2159, %v1799_v49   ;;  %642 = vperm.xlu0 %2158, %v1798_v50  }
  0x39   :  { %657 = vperm.xlu1 %2159, %v1801_v51   ;;  %652 = vperm.xlu0 %2158, %v1800_v52  }
  0x3a   :  { %2079 = vmatmul.mubr.msk.bf16.vlgmr.msra.gmra.mrb[16].mxu0 %vm117_vm0, %v2183_v53  ;;  %2105 = vmatmul.mubr.msk.bf16.vlgmr.msra.gmra.mrb[16].mxu1 %vm117_vm0, %v2184_v54 }
  0x3b   :  { %2121 = vmatpush3.bf16.msra.mxu0 %v2272_v4  ;;  %2082 = vmatprep.mubr.msk.bf16.mxu0 %vm117_vm0, %v2185_v55 }
  0x3c   :  { %2108 = vmatprep.mubr.msk.bf16.mxu1 %vm117_vm0, %v2186_v56  ;;  %2122 = vmatprep.subr.bf16.mxu0 %v2285_v7 }
  0x3d   :  { %667 = vperm.xlu1 %2159, %v1803_v57   ;;  %662 = vperm.xlu0 %2158, %v1802_v58  }
  0x3e   :  { %2151 = vmatpush3.bf16.msra.mxu1 %v2272_v4  ;;  %v1840_v4 = vld [vmem:[%s2981_s2 + $0x110] sm:$0xff] }
  0x3f   :  { %2123 = vmatpush3.bf16.msra.mxu0 %v2285_v7  ;;  %2147 = vmatprep.subr.bf16.mxu1 %v2285_v7 }
  0x40   :  { %2124 = vmatprep.subr.bf16.mxu0 %v2294_v8 }
  0x41   :  { %677 = vperm.xlu1 %2159, %v1805_v59   ;;  %672 = vperm.xlu0 %2158, %v1804_v60  }
  0x42   :  { %2083 = vmatmul.mubr.msk.bf16.gmra.mrb[20].mxu0 %vm117_vm0, %v2187_v61  ;;  %2109 = vmatmul.mubr.msk.bf16.gmra.mrb[20].mxu1 %vm117_vm0, %v2188_v62 }
  0x43   :  { %2125 = vmatpush3.bf16.msra.mxu0 %v2294_v8  ;;  %2086 = vmatprep.mubr.msk.bf16.mxu0 %vm117_vm0, %v2189_v63 }
  0x44   :  { %2112 = vmatprep.mubr.msk.bf16.mxu1 %vm117_vm0, %v2190_v0  ;;  %2152 = vmatpush3.bf16.msra.mxu1 %v2285_v7  ;;  %v2193_v7 = vld [vmem:[%s2980_s1 + $0xb0] sm:$0xff]  }
  0x45   :  { %936 = vperm.xlu1 %2159, %v1839_v1   ;;  %931 = vperm.xlu0 %2158, %v1838_v2  }
  0x46   :  { %2148 = vmatprep.subr.bf16.mxu1 %v2294_v8  ;;  %2126 = vmatprep.subr.bf16.mxu0 %v2307_v11 }
  0x47   :  { %2127 = vmatpush3.bf16.msra.mxu0 %v2307_v11 }
  0x48   :  { %2153 = vmatpush3.bf16.msra.mxu1 %v2294_v8  ;;  %2128 = vmatprep.subr.bf16.mxu0 %v2331_v16 }
  0x49   :  { %946 = vperm.xlu1 %2159, %v1841_v3   ;;  %941 = vperm.xlu0 %2158, %v1840_v4  }
  0x4a   :  { %2087 = vmatmul.mubr.msk.bf16.gmra.mrb[24].mxu0 %vm117_vm0, %v2191_v5  ;;  %2113 = vmatmul.mubr.msk.bf16.gmra.mrb[24].mxu1 %vm117_vm0, %v2192_v6 }
  0x4b   :  { %2090 = vmatprep.mubr.msk.bf16.mxu0 %vm117_vm0, %v2193_v7  ;;  %2116 = vmatprep.mubr.msk.bf16.mxu1 %vm117_vm0, %v2194_v9 }
  0x4c   :  { %11 = vsyncpa [#allocation4], 0  ;;  %2149 = vmatprep.subr.bf16.mxu1 %v2307_v11  ;;  %2129 = vmatpush3.bf16.msra.mxu0 %v2331_v16  ;;  %v1845_v8 = vld [vmem:[%s2981_s2 + $0x138] sm:$0xff]  ;;  %v1844_v13 = vld [vmem:[%s2981_s2 + $0x130] sm:$0xff] }
  0x4d   :  { %956 = vperm.xlu1 %2159, %v1843_v10   ;;  %951 = vperm.xlu0 %2158, %v1842_v12   ;;  %v2195_v14 = vld [vmem:[%s2980_s1 + $0xb8] sm:$0xff]   ;;  %v2197_v17 = vld [vmem:[%s2980_s1 + $0x100] sm:$0xff]   ;;  %v1848_v21 = vld [vmem:[%s2981_s2 + $0x150] sm:$0xff] }
  0x4e   :  { %v2196_v15 = vld [vmem:[%s2980_s1 + $0xf8] sm:$0xff]   ;;  %2154 = vmatpush3.bf16.msra.mxu1 %v2307_v11  ;;  %v2198_v18 = vld [vmem:[%s2980_s1 + $0x120] sm:$0xff]   ;;  %v1847_v11 = vld [vmem:[%s2981_s2 + $0x148] sm:$0xff] }
  0x4f   :  { %2150 = vmatprep.subr.bf16.mxu1 %v2331_v16  ;;  %v1846_v19 = vld [vmem:[%s2981_s2 + $0x140] sm:$0xff]  ;;  %v1849_v20 = vld [vmem:[%s2981_s2 + $0x158] sm:$0xff]  ;;  %v2199_v22 = vld [vmem:[%s2980_s1 + $0x108] sm:$0xff]  }
  0x50   :  { %v2201_v23 = vld [vmem:[%s2980_s1 + $0x110] sm:$0xff]   ;;  %v1851_v25 = vld [vmem:[%s2981_s2 + $0x168] sm:$0xff]  ;;  %v1850_v26 = vld [vmem:[%s2981_s2 + $0x160] sm:$0xff] }
  0x51   :  { %966 = vperm.xlu1 %2159, %v1845_v8   ;;  %961 = vperm.xlu0 %2158, %v1844_v13   ;;  %v2202_v24 = vld [vmem:[%s2980_s1 + $0x130] sm:$0xff]   ;;  %v1887_v27 = vld [vmem:[%s2981_s2 + $0x188] sm:$0xff]  ;;  %v1886_v28 = vld [vmem:[%s2981_s2 + $0x180] sm:$0xff] }
  0x52   :  { %2091 = vmatmul.mubr.msk.bf16.gmra.mrb[28].mxu0 %vm117_vm0, %v2195_v14  ;;  %2117 = vmatmul.mubr.msk.bf16.gmra.mrb[28].mxu1 %vm117_vm0, %v2196_v15  ;;  %v2203_v29 = vld [vmem:[%s2980_s1 + $0x118] sm:$0xff]   ;;  %v1934_v31 = vld [vmem:[%s2981_s2 + $0x200] sm:$0xff]  ;;  %v1888_v32 = vld [vmem:[%s2981_s2 + $0x190] sm:$0xff] }
  0x53   :  { %2155 = vmatpush3.bf16.msra.mxu1 %v2331_v16  ;;  %2130 = vmatprep.mubr.msk.bf16.mxu0 %vm117_vm0, %v2197_v17  ;;  %v2200_v16 = vld [vmem:[%s2980_s1 + $0x128] sm:$0xff]   ;;  %v2204_v30 = vld [vmem:[%s2980_s1 + $0x138] sm:$0xff]   ;;  %v1890_v35 = vld [vmem:[%s2981_s2 + $0x1a0] sm:$0xff] }
  0x54   :  { %2138 = vmatprep.mubr.msk.bf16.mxu1 %vm117_vm0, %v2198_v18  ;;  %v1889_v33 = vld [vmem:[%s2981_s2 + $0x198] sm:$0xff]  ;;  %v1935_v34 = vld [vmem:[%s2981_s2 + $0x208] sm:$0xff]  ;;  %v1936_v36 = vld [vmem:[%s2981_s2 + $0x210] sm:$0xff] }
  0x55   :  { %976 = vperm.xlu1 %2159, %v1847_v11   ;;  %971 = vperm.xlu0 %2158, %v1846_v19   ;;  %v1891_v37 = vld [vmem:[%s2981_s2 + $0x1a8] sm:$0xff]  ;;  %v1937_v38 = vld [vmem:[%s2981_s2 + $0x218] sm:$0xff]  ;;  %v1892_v39 = vld [vmem:[%s2981_s2 + $0x1b0] sm:$0xff] }
  0x56   :  { %v1938_v40 = vld [vmem:[%s2981_s2 + $0x220] sm:$0xff]  ;;  %v1893_v41 = vld [vmem:[%s2981_s2 + $0x1b8] sm:$0xff]  ;;  %v1939_v42 = vld [vmem:[%s2981_s2 + $0x228] sm:$0xff] }
  0x57   :  { %v1894_v43 = vld [vmem:[%s2981_s2 + $0x1c0] sm:$0xff]  ;;  %v1940_v44 = vld [vmem:[%s2981_s2 + $0x230] sm:$0xff]  ;;  %v1895_v45 = vld [vmem:[%s2981_s2 + $0x1c8] sm:$0xff] }
  0x58   :  { %v1941_v46 = vld [vmem:[%s2981_s2 + $0x238] sm:$0xff]  ;;  %v1896_v47 = vld [vmem:[%s2981_s2 + $0x1d0] sm:$0xff]  ;;  %v1942_v48 = vld [vmem:[%s2981_s2 + $0x240] sm:$0xff] }
  0x59   :  { %986 = vperm.xlu1 %2159, %v1849_v20   ;;  %981 = vperm.xlu0 %2158, %v1848_v21   ;;  %v1897_v51 = vld [vmem:[%s2981_s2 + $0x1d8] sm:$0xff]  ;;  %v1943_v52 = vld [vmem:[%s2981_s2 + $0x248] sm:$0xff]  ;;  %v1898_v55 = vld [vmem:[%s2981_s2 + $0x1e0] sm:$0xff] }
  0x5a   :  { %2131 = vmatmul.mubr.msk.bf16.vlgmr.msra.gmra.mrb[32].mxu0 %vm117_vm0, %v2199_v22  ;;  %2139 = vmatmul.mubr.msk.bf16.vlgmr.msra.gmra.mrb[32].mxu1 %vm117_vm0, %v2200_v16  ;;  %v1944_v56 = vld [vmem:[%s2981_s2 + $0x250] sm:$0xff]  ;;  %v1945_v60 = vld [vmem:[%s2981_s2 + $0x258] sm:$0xff]  ;;  %v1946_v63 = vld [vmem:[%s2981_s2 + $0x260] sm:$0xff] }
  0x5b   :  { %2134 = vmatprep.mubr.msk.bf16.mxu0 %vm117_vm0, %v2201_v23  ;;  %2142 = vmatprep.mubr.msk.bf16.mxu1 %vm117_vm0, %v2202_v24  ;;  %v1852_v59 = vld [vmem:[%s2981_s2 + $0x170] sm:$0xff]  ;;  %v1899_v0 = vld [vmem:[%s2981_s2 + $0x1e8] sm:$0xff]  ;;  %v1853_v4 = vld [vmem:[%s2981_s2 + $0x178] sm:$0xff] }
  0x5c   :  { %v1900_v3 = vld [vmem:[%s2981_s2 + $0x1f0] sm:$0xff]  ;;  %v1901_v7 = vld [vmem:[%s2981_s2 + $0x1f8] sm:$0xff]  ;;  %v1947_v9 = vld [vmem:[%s2981_s2 + $0x268] sm:$0xff] }
  0x5d   :  { %996 = vperm.xlu1 %2159, %v1851_v25   ;;  %991 = vperm.xlu0 %2158, %v1850_v26   ;;  %v1949_v8 = vld [vmem:[%s2981_s2 + $0x278] sm:$0xff]  ;;  %v1948_v13 = vld [vmem:[%s2981_s2 + $0x270] sm:$0xff]  ;;  %v1705_v17 = vld [vmem:[#allocation2] sm:$0x1]  ;;  %s2234_s2 = smov [#allocation3]  }
  0x5e   :  { %s1729_s1 = sshll.u32 %s2234_s2, 4  ;;  %s1730_s1 = int_to_ptr.vmem [resolvable:$true] %s1729_s1 }
  0x5f   :  { %s2209_s14 = scalar_lea.vmem %s1730_s1, 16  ;;  %s2213_s15 = scalar_lea.vmem %s1730_s1, 32 }
  0x60   :  { %p2210_p0 = scmp.ne.s32.totalorder %s1730_s1, %s2209_s14  ;;  %p2214_p1 = scmp.lt.s32.totalorder %s1730_s1, %s1730_s1 }
  0x61   :  { %1265 = vperm.xlu1 %2159, %v1887_v27   ;;  %1260 = vperm.xlu0 %2158, %v1886_v28   ;;  %p2215_p2 = scmp.lt.s32.totalorder %s2213_s15, %s2209_s14 }
  0x62   :  { %2135 = vmatmul.mubr.msk.bf16.gmra.mrb[36].mxu0 %vm117_vm0, %v2203_v29  ;;  %2143 = vmatmul.mubr.msk.bf16.gmra.mrb[36].mxu1 %vm117_vm0, %v2204_v30 }
  0x63   :  { %p2216_p3 = por %p2215_p2, %p2214_p1 }
  0x65   :  { %1589 = vperm.xlu1 %2159, %v1934_v31   ;;  %1270 = vperm.xlu0 %2158, %v1888_v32   ;;  %p2217_p4 = pnand %p2216_p3, %p2210_p0 }
  0x69   :  { %1275 = vperm.xlu1 %2159, %v1889_v33   ;;  %1594 = vperm.xlu0 %2158, %v1935_v34  }
  0x6d   :  { %1280 = vperm.xlu1 %2159, %v1890_v35   ;;  %1599 = vperm.xlu0 %2158, %v1936_v36  }
  0x71   :  { %1285 = vperm.xlu1 %2159, %v1891_v37   ;;  %1604 = vperm.xlu0 %2158, %v1937_v38  }
  0x75   :  { %1290 = vperm.xlu1 %2159, %v1892_v39   ;;  %1609 = vperm.xlu0 %2158, %v1938_v40  }
  0x79   :  { %1295 = vperm.xlu1 %2159, %v1893_v41   ;;  %1614 = vperm.xlu0 %2158, %v1939_v42  }
  0x7d   :  { %1300 = vperm.xlu1 %2159, %v1894_v43   ;;  %1619 = vperm.xlu0 %2158, %v1940_v44  }
  0x81   :  { %1305 = vperm.xlu1 %2159, %v1895_v45   ;;  %1624 = vperm.xlu0 %2158, %v1941_v46  }
  0x84   :  { %v2706_v49 = vpop.permute.xlu1 %283  ;;  %v2708_v50 = vpop.permute.xlu0 %273 }
  0x85   :  { %1310 = vperm.xlu1 %2159, %v1896_v47   ;;  %1629 = vperm.xlu0 %2158, %v1942_v48  }
  0x88   :  { %v2716_v53 = vpop.permute.xlu1 %288  ;;  %v2718_v54 = vpop.permute.xlu0 %278 }
  0x89   :  { %1315 = vperm.xlu1 %2159, %v1897_v51   ;;  %1634 = vperm.xlu0 %2158, %v1943_v52  }
  0x8c   :  { %v2726_v57 = vpop.permute.xlu1 %298  ;;  %v2728_v58 = vpop.permute.xlu0 %293 }
  0x8d   :  { %1320 = vperm.xlu1 %2159, %v1898_v55   ;;  %1639 = vperm.xlu0 %2158, %v1944_v56  }
  0x90   :  { %v2736_v61 = vpop.permute.xlu1 %308  ;;  %v2738_v62 = vpop.permute.xlu0 %303 }
  0x91   :  { %1001 = vperm.xlu1 %2159, %v1852_v59   ;;  %1644 = vperm.xlu0 %2158, %v1945_v60  }
  0x94   :  { %v2746_v1 = vpop.permute.xlu1 %318  ;;  %v2748_v2 = vpop.permute.xlu0 %313 }
  0x95   :  { %1649 = vperm.xlu1 %2159, %v1946_v63   ;;  %1325 = vperm.xlu0 %2158, %v1899_v0  }
  0x98   :  { %v2756_v5 = vpop.permute.xlu1 %328  ;;  %v2758_v6 = vpop.permute.xlu0 %323 }
  0x99   :  { %1330 = vperm.xlu1 %2159, %v1900_v3   ;;  %1006 = vperm.xlu0 %2158, %v1853_v4  }
  0x9c   :  { %v2766_v10 = vpop.permute.xlu1 %338  ;;  %v2768_v12 = vpop.permute.xlu0 %333 }
  0x9d   :  { %1335 = vperm.xlu1 %2159, %v1901_v7   ;;  %1654 = vperm.xlu0 %2158, %v1947_v9  }
  0xa0   :  { %v2776_v14 = vpop.permute.xlu1 %348  ;;  %v2778_v15 = vpop.permute.xlu0 %343 }
  0xa1   :  { %1664 = vperm.xlu1 %2159, %v1949_v8   ;;  %1659 = vperm.xlu0 %2158, %v1948_v13  }
  0xa4   :  { %v608_v18 = vpop.permute.xlu1 %607  ;;  %v603_v11 = vpop.permute.xlu0 %602 }
  0xa5   :  { %1708 = vperm.xlu0 %2158, %v1705_v17  }
  0xa8   :  { %v2780_v19 = vpop.permute.xlu1 %617  ;;  %v613_v20 = vpop.permute.xlu0 %612 }
  0xac   :  { %v2782_v21 = vpop.permute.xlu1 %627  ;;  %v2784_v22 = vpop.permute.xlu0 %622 }
  0xb0   :  { %v2786_v16 = vpop.permute.xlu1 %637  ;;  %v2788_v23 = vpop.permute.xlu0 %632 }
  0xb4   :  { %v2790_v24 = vpop.permute.xlu1 %647  ;;  %v2792_v25 = vpop.permute.xlu0 %642 }
  0xb8   :  { %v2794_v26 = vpop.permute.xlu1 %657  ;;  %v2796_v27 = vpop.permute.xlu0 %652 }
  0xbc   :  { %v2798_v28 = vpop.permute.xlu1 %667  ;;  %v2800_v29 = vpop.permute.xlu0 %662 }
  0xc0   :  { %v2802_v30 = vpop.permute.xlu1 %677  ;;  %v2804_v31 = vpop.permute.xlu0 %672 }
  0xc4   :  { %v2806_v32 = vpop.permute.xlu1 %936  ;;  %v2808_v33 = vpop.permute.xlu0 %931 }
  0xc8   :  { %v2810_v34 = vpop.permute.xlu1 %946  ;;  %v2812_v35 = vpop.permute.xlu0 %941 }
  0xcc   :  { %v2814_v36 = vpop.permute.xlu1 %956  ;;  %v2816_v37 = vpop.permute.xlu0 %951 }
  0xcd   :  { %2984 = vst [vmem:[#allocation6_spill] sm:$0xff] %v2814_v36  ;;  %2985 = vst [vmem:[#allocation7_spill] sm:$0xff] %v2816_v37 }
  0xd0   :  { %v2818_v38 = vpop.permute.xlu1 %966  ;;  %v2820_v39 = vpop.permute.xlu0 %961 }
  0xd1   :  { %2986 = vst [vmem:[#allocation8_spill] sm:$0xff] %v2818_v38  ;;  %2987 = vst [vmem:[#allocation9_spill] sm:$0xff] %v2820_v39 }
  0xd4   :  { %v2822_v40 = vpop.permute.xlu1 %976  ;;  %v2824_v41 = vpop.permute.xlu0 %971 }
  0xd5   :  { %2988 = vst [vmem:[#allocation10_spill] sm:$0xff] %v2822_v40  ;;  %2989 = vst [vmem:[#allocation11_spill] sm:$0xff] %v2824_v41 }
  0xd8   :  { %v2826_v42 = vpop.permute.xlu1 %986  ;;  %v2828_v43 = vpop.permute.xlu0 %981 }
  0xd9   :  { %2990 = vst [vmem:[#allocation12_spill] sm:$0xff] %v2826_v42  ;;  %2991 = vst [vmem:[#allocation13_spill] sm:$0xff] %v2828_v43 }
  0xdc   :  { %v2830_v44 = vpop.permute.xlu1 %996  ;;  %v2832_v45 = vpop.permute.xlu0 %991 }
  0xdd   :  { %2992 = vst [vmem:[#allocation14_spill] sm:$0xff] %v2830_v44  ;;  %2993 = vst [vmem:[#allocation15_spill] sm:$0xff] %v2832_v45 }
  0xe0   :  { %v2834_v46 = vpop.permute.xlu1 %1265  ;;  %v2836_v47 = vpop.permute.xlu0 %1260 }
  0xe4   :  { %v2838_v48 = vpop.permute.xlu1 %1589  ;;  %v2840_v51 = vpop.permute.xlu0 %1270 }
  0xe5   :  { %2994 = vst [vmem:[#allocation16_spill] sm:$0xff] %v2838_v48 }
  0xe8   :  { %v2842_v52 = vpop.permute.xlu1 %1275  ;;  %v2844_v55 = vpop.permute.xlu0 %1594 }
  0xe9   :  { %2995 = vst [vmem:[#allocation17_spill] sm:$0xff] %v2844_v55 }
  0xec   :  { %v2846_v56 = vpop.permute.xlu1 %1280  ;;  %v2848_v59 = vpop.permute.xlu0 %1599 }
  0xed   :  { %2996 = vst [vmem:[#allocation18_spill] sm:$0xff] %v2846_v56  ;;  %2997 = vst [vmem:[#allocation19_spill] sm:$0xff] %v2848_v59  ;;  %v2028_v60 = vpop.f32.mrb[0].mxu0  ;;  %v2054_v63 = vpop.f32.mrb[0].mxu1 }
  0xee   :  { %v176_v0 = vpop.f32.mrb[1].mxu0  ;;  %v504_v3 = vpop.f32.mrb[1].mxu1  ;;  %v241_v45 = vmax.f32 %v2028_v60, 0.0  ;;  %v569_v55 = vmax.f32 %v2054_v63, 0.0 }
  0xef   :  { %v2029_v4 = vpop.f32.mrb[2].mxu0  ;;  %v2055_v7 = vpop.f32.mrb[2].mxu1  ;;  %v239_v9 = vmax.f32 %v176_v0, 0.0  ;;  %v567_v8 = vmax.f32 %v504_v3, 0.0 }
  0xf0   :  { %v2850_v13 = vpop.permute.xlu1 %1285  ;;  %v2852_v17 = vpop.permute.xlu0 %1604  ;;  %v242_v40 = vmax.f32 %v2029_v4, 0.0  ;;  %v570_v59 = vmax.f32 %v2055_v7, 0.0  ;;  %v353_v56 = vmul.f32 %v2706_v49, %v241_v45  ;;  %v682_v60 = vmul.f32 %v613_v20, %v569_v55 }
  0xf1   :  { %2998 = vst [vmem:[#allocation20_spill] sm:$0xff] %v2850_v13  ;;  %2999 = vst [vmem:[#allocation21_spill] sm:$0xff] %v2852_v17  ;;  %v179_v48 = vpop.f32.mrb[3].mxu0  ;;  %v507_v44 = vpop.f32.mrb[3].mxu1  ;;  %v351_v41 = vmul.f32 %v2708_v50, %v239_v9  ;;  %v680_v38 = vmul.f32 %v603_v11, %v567_v8 }
  0xf2   :  { %v240_v42 = vmax.f32 %v179_v48, 0.0  ;;  %v568_v43 = vmax.f32 %v507_v44, 0.0 }
  0xf4   :  { %v352_v39 = vmul.f32 %v2718_v54, %v240_v42  ;;  %v681_v36 = vmul.f32 %v608_v18, %v568_v43  ;;  %v2856_v0 = vpop.permute.xlu1 %1290  ;;  %v2858_v3 = vpop.permute.xlu0 %1609  ;;  %v354_v54 = vmul.f32 %v2716_v53, %v242_v40  ;;  %v683_v18 = vmul.f32 %v2780_v19, %v570_v59 }
  0xf5   :  { %v2032_v13 = vpop.f32.mrb[4].mxu0  ;;  %v2058_v17 = vpop.f32.mrb[4].mxu1 }
  0xf6   :  { %v367_v63 = vadd.f32 %v352_v39, %v351_v41  ;;  %v696_v48 = vadd.f32 %v681_v36, %v680_v38  ;;  %v192_v44 = vpop.f32.mrb[5].mxu0  ;;  %v520_v4 = vpop.f32.mrb[5].mxu1  ;;  %v245_v49 = vmax.f32 %v2032_v13, 0.0  ;;  %v573_v20 = vmax.f32 %v2058_v17, 0.0 }
  0xf7   :  { %v243_v7 = vmax.f32 %v192_v44, 0.0  ;;  %v571_v37 = vmax.f32 %v520_v4, 0.0  ;;  %v2033_v50 = vpop.f32.mrb[6].mxu0  ;;  %v2059_v11 = vpop.f32.mrb[6].mxu1 }
  0xf8   :  { %v368_v42 = vadd.f32 %v367_v63, %v353_v56  ;;  %v697_v43 = vadd.f32 %v696_v48, %v682_v60  ;;  %v2863_v9 = vpop.permute.xlu1 %1295  ;;  %v2865_v8 = vpop.permute.xlu0 %1614  ;;  %v246_v40 = vmax.f32 %v2033_v50, 0.0  ;;  %v574_v19 = vmax.f32 %v2059_v11, 0.0 }
  0xf9   :  { %v355_v36 = vmul.f32 %v2728_v58, %v243_v7  ;;  %v684_v38 = vmul.f32 %v2784_v22, %v571_v37  ;;  %v195_v39 = vpop.f32.mrb[7].mxu0  ;;  %v523_v41 = vpop.f32.mrb[7].mxu1  ;;  %v357_v37 = vmul.f32 %v2738_v62, %v245_v49  ;;  %v686_v48 = vmul.f32 %v2788_v23, %v573_v20 }
  0xfa   :  { %v369_v45 = vadd.f32 %v368_v42, %v354_v54  ;;  %v698_v55 = vadd.f32 %v697_v43, %v683_v18  ;;  %v244_v44 = vmax.f32 %v195_v39, 0.0  ;;  %v572_v53 = vmax.f32 %v523_v41, 0.0 }
  0xfb   :  { %v687_v43 = vmul.f32 %v2786_v16, %v574_v19 }
  0xfc   :  { %v370_v56 = vadd.f32 %v369_v45, %v355_v36  ;;  %v699_v59 = vadd.f32 %v698_v55, %v684_v38  ;;  %v356_v60 = vmul.f32 %v2726_v57, %v244_v44  ;;  %v685_v63 = vmul.f32 %v2782_v21, %v572_v53  ;;  %v2871_v13 = vpop.permute.xlu1 %1300  ;;  %v2873_v17 = vpop.permute.xlu0 %1619 }
  0xfd   :  { %v2036_v58 = vpop.f32.mrb[8].mxu0  ;;  %v2062_v22 = vpop.f32.mrb[8].mxu1  ;;  %v358_v21 = vmul.f32 %v2736_v61, %v246_v40 }
  0xfe   :  { %v371_v4 = vadd.f32 %v370_v56, %v356_v60  ;;  %v700_v7 = vadd.f32 %v699_v59, %v685_v63  ;;  %v208_v50 = vpop.f32.mrb[9].mxu0  ;;  %v536_v11 = vpop.f32.mrb[9].mxu1  ;;  %v249_v62 = vmax.f32 %v2036_v58, 0.0  ;;  %v577_v23 = vmax.f32 %v2062_v22, 0.0 }
  0xff   :  { %v247_v54 = vmax.f32 %v208_v50, 0.0  ;;  %v575_v18 = vmax.f32 %v536_v11, 0.0  ;;  %v2037_v42 = vpop.f32.mrb[10].mxu0  ;;  %v2063_v57 = vpop.f32.mrb[10].mxu1 }
 0x100   :  { %v372_v36 = vadd.f32 %v371_v4, %v357_v37  ;;  %v701_v38 = vadd.f32 %v700_v7, %v686_v48  ;;  %v2879_v39 = vpop.permute.xlu1 %1305  ;;  %v2881_v41 = vpop.permute.xlu0 %1624  ;;  %v250_v40 = vmax.f32 %v2037_v42, 0.0  ;;  %v578_v16 = vmax.f32 %v2063_v57, 0.0 }
 0x101   :  { %v359_v49 = vmul.f32 %v2748_v2, %v247_v54  ;;  %v688_v20 = vmul.f32 %v2792_v25, %v575_v18  ;;  %v211_v45 = vpop.f32.mrb[11].mxu0  ;;  %v539_v55 = vpop.f32.mrb[11].mxu1  ;;  %v361_v37 = vmul.f32 %v2758_v6, %v249_v62  ;;  %v690_v48 = vmul.f32 %v2796_v27, %v577_v23 }
 0x102   :  { %v373_v44 = vadd.f32 %v372_v36, %v358_v21  ;;  %v702_v53 = vadd.f32 %v701_v38, %v687_v43  ;;  %v248_v56 = vmax.f32 %v211_v45, 0.0  ;;  %v576_v61 = vmax.f32 %v539_v55, 0.0 }
 0x103   :  { %v691_v57 = vmul.f32 %v2794_v26, %v578_v16 }
 0x104   :  { %v374_v19 = vadd.f32 %v373_v44, %v359_v49  ;;  %v703_v59 = vadd.f32 %v702_v53, %v688_v20  ;;  %v360_v60 = vmul.f32 %v2746_v1, %v248_v56  ;;  %v689_v63 = vmul.f32 %v2790_v24, %v576_v61  ;;  %v2887_v58 = vpop.permute.xlu1 %1310  ;;  %v2889_v22 = vpop.permute.xlu0 %1629 }
 0x105   :  { %v2040_v2 = vpop.f32.mrb[12].mxu0  ;;  %v2066_v25 = vpop.f32.mrb[12].mxu1  ;;  %v362_v24 = vmul.f32 %v2756_v5, %v250_v40 }
 0x106   :  { %v375_v4 = vadd.f32 %v374_v19, %v360_v60  ;;  %v704_v7 = vadd.f32 %v703_v59, %v689_v63  ;;  %v224_v50 = vpop.f32.mrb[13].mxu0  ;;  %v552_v11 = vpop.f32.mrb[13].mxu1  ;;  %v253_v38 = vmax.f32 %v2040_v2, 0.0  ;;  %v581_v6 = vmax.f32 %v2066_v25, 0.0 }
 0x107   :  { %v251_v54 = vmax.f32 %v224_v50, 0.0  ;;  %v579_v18 = vmax.f32 %v552_v11, 0.0  ;;  %v2041_v42 = vpop.f32.mrb[14].mxu0  ;;  %v2067_v1 = vpop.f32.mrb[14].mxu1 }
 0x108   :  { %v376_v21 = vadd.f32 %v375_v4, %v361_v37  ;;  %v705_v43 = vadd.f32 %v704_v7, %v690_v48  ;;  %v2895_v36 = vpop.permute.xlu1 %1315  ;;  %v227_v23 = vpop.f32.mrb[15].mxu0  ;;  %v254_v53 = vmax.f32 %v2041_v42, 0.0  ;;  %v582_v5 = vmax.f32 %v2067_v1, 0.0 }
 0x109   :  { %v363_v27 = vmul.f32 %v2768_v12, %v251_v54  ;;  %v692_v62 = vmul.f32 %v2800_v29, %v579_v18  ;;  %v555_v49 = vpop.f32.mrb[15].mxu1  ;;  %v252_v55 = vmax.f32 %v227_v23, 0.0  ;;  %v2899_v61 = vpop.permute.xlu0 %1634  ;;  %v365_v59 = vmul.f32 %v2778_v15, %v253_v38 }
 0x10a   :  { %v377_v20 = vadd.f32 %v376_v21, %v362_v24  ;;  %v706_v45 = vadd.f32 %v705_v43, %v691_v57  ;;  %v580_v44 = vmax.f32 %v555_v49, 0.0  ;;  %v694_v60 = vmul.f32 %v2804_v31, %v581_v6 }
 0x10b   :  { %v364_v40 = vmul.f32 %v2766_v10, %v252_v55  ;;  %v366_v10 = vmul.f32 %v2776_v14, %v254_v53 }
 0x10c   :  { %v378_v56 = vadd.f32 %v377_v20, %v363_v27  ;;  %v707_v26 = vadd.f32 %v706_v45, %v692_v62  ;;  %v693_v16 = vmul.f32 %v2798_v28, %v580_v44  ;;  %v2903_v19 = vpop.permute.xlu1 %1320  ;;  %v695_v28 = vmul.f32 %v2802_v30, %v582_v5 }
 0x10d   :  { %v2080_v12 = vpop.f32.mrb[16].mxu0  ;;  %v2106_v29 = vpop.f32.mrb[16].mxu1 }
 0x10e   :  { %v379_v63 = vadd.f32 %v378_v56, %v364_v40  ;;  %v708_v2 = vadd.f32 %v707_v26, %v693_v16  ;;  %v833_v25 = vpop.f32.mrb[17].mxu0  ;;  %v1162_v37 = vpop.f32.mrb[17].mxu1  ;;  %v898_v18 = vmax.f32 %v2080_v12, 0.0  ;;  %v1227_v42 = vmax.f32 %v2106_v29, 0.0 }
 0x10f   :  { %v896_v48 = vmax.f32 %v833_v25, 0.0  ;;  %v1225_v4 = vmax.f32 %v1162_v37, 0.0  ;;  %v2081_v7 = vpop.f32.mrb[18].mxu0  ;;  %v2107_v50 = vpop.f32.mrb[18].mxu1  ;;  %v3000_v37 = vld [vmem:[#allocation7_spill] sm:$0xff] }
 0x110   :  { %v380_v11 = vadd.f32 %v379_v63, %v365_v59  ;;  %v709_v54 = vadd.f32 %v708_v2, %v694_v60  ;;  %v836_v1 = vpop.f32.mrb[19].mxu0  ;;  %v1165_v15 = vpop.f32.mrb[19].mxu1  ;;  %v899_v6 = vmax.f32 %v2081_v7, 0.0  ;;  %v1228_v27 = vmax.f32 %v2107_v50, 0.0 }
 0x111   :  { %v897_v57 = vmax.f32 %v836_v1, 0.0  ;;  %v1226_v21 = vmax.f32 %v1165_v15, 0.0  ;;  %v1009_v43 = vmul.f32 %v2808_v33, %v896_v48  ;;  %v1338_v38 = vmul.f32 %v2836_v47, %v1225_v4  ;;  %v2911_v23 = vpop.permute.xlu0 %1639  ;;  %v2913_v30 = vpop.permute.xlu1 %1001  ;;  %v3001_v4 = vld [vmem:[#allocation18_spill] sm:$0xff] }
 0x112   :  { %v381_v24 = vadd.f32 %v380_v11, %v366_v10  ;;  %v710_v31 = vadd.f32 %v709_v54, %v695_v28  ;;  %v1011_v45 = vmul.f32 %v2812_v35, %v898_v18  ;;  %v1340_v55 = vmul.f32 %v2840_v51, %v1227_v42 }
 0x113   :  { %v1010_v49 = vmul.f32 %v2806_v32, %v897_v57  ;;  %v1339_v20 = vmul.f32 %v2834_v46, %v1226_v21  ;;  %v1012_v16 = vmul.f32 %v2810_v34, %v899_v6  ;;  %v1341_v12 = vmul.f32 %v2842_v52, %v1228_v27  ;;  %v3003_v27 = vld [vmem:[#allocation20_spill] sm:$0xff] }
 0x114   :  { %v382_v62 = vrot.slane %v381_v24, 4  ;;  %v711_v14 = vrot.slane %v710_v31, 4 }
 0x115   :  { %v2084_v44 = vpop.f32.mrb[20].mxu0  ;;  %v2110_v33 = vpop.f32.mrb[20].mxu1  ;;  %v1025_v5 = vadd.f32 %v1010_v49, %v1009_v43  ;;  %v1354_v56 = vadd.f32 %v1339_v20, %v1338_v38  ;;  %v3002_v38 = vld [vmem:[#allocation6_spill] sm:$0xff] }
 0x116   :  { %v383_v53 = vadd.f32 %v382_v62, %v381_v24  ;;  %v712_v47 = vadd.f32 %v711_v14, %v710_v31  ;;  %v849_v26 = vpop.f32.mrb[21].mxu0  ;;  %v1178_v40 = vpop.f32.mrb[21].mxu1  ;;  %v902_v2 = vmax.f32 %v2084_v44, 0.0  ;;  %v1231_v25 = vmax.f32 %v2110_v33, 0.0 }
 0x117   :  { %v900_v29 = vmax.f32 %v849_v26, 0.0  ;;  %v1229_v32 = vmax.f32 %v1178_v40, 0.0  ;;  %v2085_v59 = vpop.f32.mrb[22].mxu0  ;;  %v2111_v46 = vpop.f32.mrb[22].mxu1  ;;  %v1026_v63 = vadd.f32 %v1025_v5, %v1011_v45  ;;  %v1355_v51 = vadd.f32 %v1354_v56, %v1340_v55  ;;  %v3004_v55 = vld [vmem:[#allocation9_spill] sm:$0xff] }
 0x118   :  { %v384_v60 = vrot.slane %v383_v53, 2  ;;  %v713_v35 = vrot.slane %v712_v47, 2  ;;  %v852_v50 = vpop.f32.mrb[23].mxu0  ;;  %v1181_v10 = vpop.f32.mrb[23].mxu1  ;;  %v903_v54 = vmax.f32 %v2085_v59, 0.0  ;;  %v1232_v18 = vmax.f32 %v2111_v46, 0.0 }
 0x119   :  { %v1013_v48 = vmul.f32 %v3000_v37, %v900_v29  ;;  %v1342_v7 = vmul.f32 %v3001_v4, %v1229_v32  ;;  %v1027_v11 = vadd.f32 %v1026_v63, %v1012_v16  ;;  %v1356_v52 = vadd.f32 %v1355_v51, %v1341_v12  ;;  %v2923_v31 = vpop.permute.xlu0 %1644  ;;  %v2925_v57 = vpop.permute.xlu1 %1649  ;;  %v3005_v32 = vld [vmem:[#allocation8_spill] sm:$0xff]  ;;  %v3006_v63 = vld [vmem:[#allocation11_spill] sm:$0xff] }
 0x11a   :  { %v385_v28 = vadd.f32 %v384_v60, %v383_v53  ;;  %v714_v34 = vadd.f32 %v713_v35, %v712_v47  ;;  %v901_v42 = vmax.f32 %v852_v50, 0.0  ;;  %v1230_v1 = vmax.f32 %v1181_v10, 0.0 }
 0x11b   :  { %v1028_v21 = vadd.f32 %v1027_v11, %v1013_v48  ;;  %v1357_v43 = vadd.f32 %v1356_v52, %v1342_v7  ;;  %v1015_v44 = vmul.f32 %v3004_v55, %v902_v2  ;;  %v1344_v33 = vmul.f32 %v2856_v0, %v1231_v25  ;;  %v3009_v55 = vld [vmem:[#allocation12_spill] sm:$0xff] }
 0x11c   :  { %v386_v15 = vrot.slane %v385_v28, 1  ;;  %v715_v24 = vrot.slane %v714_v34, 1  ;;  %v1014_v6 = vmul.f32 %v3002_v38, %v901_v42  ;;  %v1343_v62 = vmul.f32 %v3003_v27, %v1230_v1 }
 0x11d   :  { %v2088_v14 = vpop.f32.mrb[24].mxu0  ;;  %v2114_v49 = vpop.f32.mrb[24].mxu1  ;;  %v1016_v59 = vmul.f32 %v3005_v32, %v903_v54  ;;  %v1345_v46 = vmul.f32 %v2863_v9, %v1232_v18  ;;  %v3007_v54 = vld [vmem:[#allocation10_spill] sm:$0xff] }
 0x11e   :  { %v387_v20 = vadd.f32 %v386_v15, %v385_v28  ;;  %v716_v45 = vadd.f32 %v715_v24, %v714_v34  ;;  %v865_v53 = vpop.f32.mrb[25].mxu0  ;;  %v1194_v47 = vpop.f32.mrb[25].mxu1  ;;  %v1029_v5 = vadd.f32 %v1028_v21, %v1014_v6  ;;  %v1358_v56 = vadd.f32 %v1357_v43, %v1343_v62  ;;  %v3008_v24 = vld [vmem:[#allocation13_spill] sm:$0xff] }
 0x11f   :  { %v904_v26 = vmax.f32 %v865_v53, 0.0  ;;  %v1233_v40 = vmax.f32 %v1194_v47, 0.0  ;;  %v2089_v16 = vpop.f32.mrb[26].mxu0  ;;  %v2115_v12 = vpop.f32.mrb[26].mxu1  ;;  %v906_v37 = vmax.f32 %v2088_v14, 0.0  ;;  %v1235_v48 = vmax.f32 %v2114_v49, 0.0 }
 0x120   :  { %v2931_v29 = vadd.f32 %v716_v45, %v387_v20  ;;  %v1030_v60 = vadd.f32 %v1029_v5, %v1015_v44  ;;  %v1359_v35 = vadd.f32 %v1358_v56, %v1344_v33  ;;  %v868_v2 = vpop.f32.mrb[27].mxu0  ;;  %v1197_v25 = vpop.f32.mrb[27].mxu1  ;;  %v907_v11 = vmax.f32 %v2089_v16, 0.0  ;;  %v3010_v56 = vld [vmem:[#allocation15_spill] sm:$0xff] }
 0x121   :  { %v1017_v51 = vmul.f32 %v3006_v63, %v904_v26  ;;  %v1346_v0 = vmul.f32 %v2871_v13, %v1233_v40  ;;  %v905_v4 = vmax.f32 %v868_v2, 0.0  ;;  %v1234_v7 = vmax.f32 %v1197_v25, 0.0  ;;  %v1326_v28 = vpop.permute.xlu0 %1325  ;;  %v1331_v34 = vpop.permute.xlu1 %1330  ;;  %v3011_v63 = vld [vmem:[#allocation14_spill] sm:$0xff] }
 0x122   :  { %v1031_v50 = vadd.f32 %v1030_v60, %v1016_v59  ;;  %v1360_v10 = vadd.f32 %v1359_v35, %v1345_v46  ;;  %v1236_v52 = vmax.f32 %v2115_v12, 0.0  ;;  %v1019_v21 = vmul.f32 %v3008_v24, %v906_v37 }
 0x123   :  { %v1018_v9 = vmul.f32 %v3007_v54, %v905_v4  ;;  %v1347_v18 = vmul.f32 %v2879_v39, %v1234_v7  ;;  %v1348_v43 = vmul.f32 %v2887_v58, %v1235_v48  ;;  %v1020_v44 = vmul.f32 %v3009_v55, %v907_v11 }
 0x124   :  { %v1032_v42 = vadd.f32 %v1031_v50, %v1017_v51  ;;  %v1361_v1 = vadd.f32 %v1360_v10, %v1346_v0  ;;  %v1349_v39 = vmul.f32 %v2895_v36, %v1236_v52 }
 0x125   :  { %v2092_v15 = vpop.f32.mrb[28].mxu0  ;;  %v2118_v13 = vpop.f32.mrb[28].mxu1 }
 0x126   :  { %v881_v38 = vpop.f32.mrb[29].mxu0  ;;  %v1210_v6 = vpop.f32.mrb[29].mxu1  ;;  %v1033_v27 = vadd.f32 %v1032_v42, %v1018_v9  ;;  %v1362_v62 = vadd.f32 %v1361_v1, %v1347_v18  ;;  %v910_v12 = vmax.f32 %v2092_v15, 0.0  ;;  %v1239_v32 = vmax.f32 %v2118_v13, 0.0 }
 0x127   :  { %v908_v14 = vmax.f32 %v881_v38, 0.0  ;;  %v1237_v49 = vmax.f32 %v1210_v6, 0.0  ;;  %v2093_v20 = vpop.f32.mrb[30].mxu0  ;;  %v2119_v45 = vpop.f32.mrb[30].mxu1 }
 0x128   :  { %v884_v33 = vpop.f32.mrb[31].mxu0  ;;  %v1213_v53 = vpop.f32.mrb[31].mxu1  ;;  %v1034_v47 = vadd.f32 %v1033_v27, %v1019_v21  ;;  %v1363_v5 = vadd.f32 %v1362_v62, %v1348_v43  ;;  %v911_v25 = vmax.f32 %v2093_v20, 0.0  ;;  %v1240_v37 = vmax.f32 %v2119_v45, 0.0  ;;  %v3012_v27 = vld [vmem:[#allocation16_spill] sm:$0xff] }
 0x129   :  { %v1021_v26 = vmul.f32 %v3010_v56, %v908_v14  ;;  %v1350_v58 = vmul.f32 %v2903_v19, %v1237_v49  ;;  %v909_v40 = vmax.f32 %v884_v33, 0.0  ;;  %v1238_v16 = vmax.f32 %v1213_v53, 0.0  ;;  %v1007_v60 = vpop.permute.xlu0 %1006  ;;  %v1336_v35 = vpop.permute.xlu1 %1335 }
 0x12a   :  { %v1035_v59 = vadd.f32 %v1034_v47, %v1020_v44  ;;  %v1364_v46 = vadd.f32 %v1363_v5, %v1349_v39  ;;  %v1023_v50 = vmul.f32 %v2913_v30, %v910_v12  ;;  %v1352_v10 = vmul.f32 %v1331_v34, %v1239_v32  ;;  %v3013_v34 = vld [vmem:[#allocation17_spill] sm:$0xff]  ;;  %v3014_v44 = vld [vmem:[#allocation19_spill] sm:$0xff] }
 0x12b   :  { %v1022_v51 = vmul.f32 %v3011_v63, %v909_v40  ;;  %v1351_v0 = vmul.f32 %v1326_v28, %v1238_v16  ;;  %v1024_v1 = vmul.f32 %v1007_v60, %v911_v25  ;;  %v1353_v15 = vmul.f32 %v1336_v35, %v1240_v37  ;;  %v3015_v16 = vld [vmem:[#allocation21_spill] sm:$0xff] }
 0x12c   :  { %v1036_v36 = vadd.f32 %v1035_v59, %v1021_v26  ;;  %v1365_v2 = vadd.f32 %v1364_v46, %v1350_v58 }
 0x12d   :  { %v2132_v48 = vpop.f32.mrb[32].mxu0  ;;  %v2946_v4 = vpop.f32.mrb[32].mxu1 }
 0x12e   :  { %v1491_v7 = vpop.f32.mrb[33].mxu0  ;;  %v1523_v19 = vpop.f32.mrb[33].mxu1  ;;  %v1037_v11 = vadd.f32 %v1036_v36, %v1022_v51  ;;  %v1366_v52 = vadd.f32 %v1365_v2, %v1351_v0  ;;  %v1556_v21 = vmax.f32 %v2132_v48, 0.0 }
 0x12f   :  { %v2133_v54 = vpop.f32.mrb[34].mxu0  ;;  %v2949_v9 = vpop.f32.mrb[34].mxu1  ;;  %v1554_v18 = vmax.f32 %v1491_v7, 0.0 }
 0x130   :  { %v1494_v42 = vpop.f32.mrb[35].mxu0  ;;  %v1526_v28 = vpop.f32.mrb[35].mxu1  ;;  %v1038_v13 = vadd.f32 %v1037_v11, %v1023_v50  ;;  %v1367_v24 = vadd.f32 %v1366_v52, %v1352_v10  ;;  %v1557_v30 = vmax.f32 %v2133_v54, 0.0  ;;  %v1669_v39 = vmul.f32 %v3014_v44, %v1556_v21 }
 0x131   :  { %v1555_v43 = vmax.f32 %v1494_v42, 0.0  ;;  %v1667_v62 = vmul.f32 %v3012_v27, %v1554_v18  ;;  %v1562_v11 = vmax.f32 %v1523_v19, 0.0  ;;  %v1563_v42 = vmax.f32 %v1526_v28, 0.0  ;;  %v1665_v44 = vpop.permute.xlu1 %1664 }
 0x132   :  { %v1039_v38 = vadd.f32 %v1038_v13, %v1024_v1  ;;  %v1368_v6 = vadd.f32 %v1367_v24, %v1353_v15  ;;  %v1670_v12 = vmul.f32 %v3015_v16, %v1557_v30  ;;  %v1564_v24 = vmax.f32 %v2946_v4, 0.0 }
 0x133   :  { %v1668_v14 = vmul.f32 %v3013_v34, %v1555_v43  ;;  %v1675_v21 = vmul.f32 %v2889_v22, %v1562_v11  ;;  %v1676_v19 = vmul.f32 %v2899_v61, %v1563_v42 }
 0x134   :  { %v1040_v49 = vrot.slane %v1039_v38, 4  ;;  %v1369_v20 = vrot.slane %v1368_v6, 4 }
 0x135   :  { %v2136_v45 = vpop.f32.mrb[36].mxu0  ;;  %v2144_v55 = vpop.f32.mrb[36].mxu1  ;;  %v1683_v33 = vadd.f32 %v1668_v14, %v1667_v62 }
 0x136   :  { %v1507_v53 = vpop.f32.mrb[37].mxu0  ;;  %v1539_v47 = vpop.f32.mrb[37].mxu1  ;;  %v1041_v5 = vadd.f32 %v1040_v49, %v1039_v38  ;;  %v1370_v56 = vadd.f32 %v1369_v20, %v1368_v6  ;;  %v1560_v51 = vmax.f32 %v2136_v45, 0.0  ;;  %v1565_v38 = vmax.f32 %v2949_v9, 0.0 }
 0x137   :  { %v1558_v26 = vmax.f32 %v1507_v53, 0.0  ;;  %v2137_v58 = vpop.f32.mrb[38].mxu0  ;;  %v2145_v40 = vpop.f32.mrb[38].mxu1  ;;  %v1684_v32 = vadd.f32 %v1683_v33, %v1669_v39  ;;  %v1677_v6 = vmul.f32 %v2911_v23, %v1564_v24  ;;  %v1566_v28 = vmax.f32 %v1539_v47, 0.0 }
 0x138   :  { %v1510_v59 = vpop.f32.mrb[39].mxu0  ;;  %v1542_v46 = vpop.f32.mrb[39].mxu1  ;;  %v1042_v60 = vrot.slane %v1041_v5, 2  ;;  %v1371_v35 = vrot.slane %v1370_v56, 2  ;;  %v1561_v48 = vmax.f32 %v2137_v58, 0.0  ;;  %v1673_v52 = vmul.f32 %v2873_v17, %v1560_v51 }
 0x139   :  { %v1671_v63 = vmul.f32 %v2858_v3, %v1558_v26  ;;  %v1685_v0 = vadd.f32 %v1684_v32, %v1670_v12  ;;  %v1559_v36 = vmax.f32 %v1510_v59, 0.0  ;;  %v1678_v62 = vmul.f32 %v2923_v31, %v1565_v38 }
 0x13a   :  { %v1043_v2 = vadd.f32 %v1042_v60, %v1041_v5  ;;  %v1372_v25 = vadd.f32 %v1371_v35, %v1370_v56  ;;  %v1674_v1 = vmul.f32 %v2881_v41, %v1561_v48  ;;  %v1655_v41 = vpop.permute.xlu0 %1654  ;;  %v1567_v30 = vmax.f32 %v1542_v46, 0.0 }
 0x13b   :  { %v1686_v37 = vadd.f32 %v1685_v0, %v1671_v63  ;;  %v1672_v7 = vmul.f32 %v2865_v8, %v1559_v36  ;;  %v1568_v34 = vmax.f32 %v2144_v55, 0.0  ;;  %v1679_v4 = vmul.f32 %v2925_v57, %v1566_v28 }
 0x13c   :  { %v1044_v50 = vrot.slane %v1043_v2, 1  ;;  %v1373_v10 = vrot.slane %v1372_v25, 1  ;;  %v1569_v14 = vmax.f32 %v2145_v40, 0.0  ;;  %v1680_v49 = vmul.f32 %v1655_v41, %v1567_v30 }
 0x13d   :  { %v1687_v54 = vadd.f32 %v1686_v37, %v1672_v7  ;;  %v1711_v53 = vlaneseq }
 0x13e   :  { %v1045_v18 = vadd.f32 %v1044_v50, %v1043_v2  ;;  %v1374_v15 = vadd.f32 %v1373_v10, %v1372_v25  ;;  %v1660_v9 = vpop.permute.xlu0 %1659  ;;  %v1682_v39 = vmul.f32 %v1665_v44, %v1569_v14 }
 0x13f   :  { %v1688_v3 = vadd.f32 %v1687_v54, %v1673_v52  ;;  %v1681_v45 = vmul.f32 %v1660_v9, %v1568_v34  ;;  %v1712_v31 = vshrl.u32 %v1711_v53, 7 }
 0x140   :  { %v1046_v13 = vadd.f32 %v1045_v18, %v2931_v29 }
 0x141   :  { %v1689_v43 = vadd.f32 %v1688_v3, %v1674_v1  ;;  %v1713_v55 = vsub.s32 0, %v1712_v31 }
 0x142   :  { %v1375_v8 = vadd.f32 %v1374_v15, %v1046_v13  ;;  %v1709_v57 = vpop.permute.xlu0 %1708 }
 0x143   :  { %v1690_v17 = vadd.f32 %v1689_v43, %v1675_v21  ;;  %v1714_v40 = vrot.slane %v1709_v57, %v1713_v55 }
 0x145   :  { %v1691_v27 = vadd.f32 %v1690_v17, %v1676_v19 }
 0x147   :  { %v1692_v29 = vadd.f32 %v1691_v27, %v1677_v6 }
 0x149   :  { %v1693_v22 = vadd.f32 %v1692_v29, %v1678_v62 }
 0x14b   :  { %v1694_v20 = vadd.f32 %v1693_v22, %v1679_v4 }
 0x14d   :  { %v1695_v61 = vadd.f32 %v1694_v20, %v1680_v49 }
 0x14f   :  { %v1696_v23 = vadd.f32 %v1695_v61, %v1681_v45 }
 0x151   :  { %v1697_v33 = vadd.f32 %v1696_v23, %v1682_v39 }
 0x153   :  { %v1698_v47 = vrot.slane %v1697_v33, 4 }
 0x155   :  { %v1699_v5 = vadd.f32 %v1698_v47, %v1697_v33 }
 0x157   :  { %v1700_v56 = vrot.slane %v1699_v5, 2 }
 0x159   :  { %v1701_v26 = vadd.f32 %v1700_v56, %v1699_v5 }
 0x15b   :  { %v1702_v58 = vrot.slane %v1701_v26, 1 }
 0x15d   :  { %v1703_v16 = vadd.f32 %v1702_v58, %v1701_v26 }
 0x15f   :  { %v1704_v12 = vadd.f32 %v1703_v16, %v1375_v8 }
 0x161   :  { %v1715_v32 = vadd.f32 %v1714_v40, %v1704_v12 }
 0x163   :  { %v1950_v59 = vmul.f32 -1.442695, %v1715_v32 }
 0x165   :  { %2205 = vpow2.f32 %v1950_v59 }
 0x16f   :  { %v2206_v46 = vpop.eup %2205 }
 0x170   :  { %v1719_v60 = vadd.f32 1.0, %v2206_v46 }
 0x172   :  { %2207 = vrcp.f32 %v1719_v60 }
 0x17c   :  { %v2208_v35 = vpop.eup %2207 }
 0x17d   :  { %1722 = vst [vmem:[#allocation3] sm:$0x1] %v2208_v35 }
 0x17e   :  { %2220 = shalt.err (!%p2217_p4)
}
 0x17f   :  { %s2221_s18 = scalar_lea.hbm %s2983_s4, 16 }
 0x180   :  { %p2222_p5 = scmp.ne.s32.totalorder %s2983_s4, %s2221_s18  ;;  %p2225_p6 = scmp.lt.u32.totalorder %s2221_s18, %s2983_s4 }
 0x182   :  { %p2227_p7 = pnand %p2225_p6, %p2222_p5 }
 0x184   :  { %2230 = shalt.err (!%p2227_p7)
}
 0x185   :  { %1732 = dma.vmem_to_hbm [thread:$0]  %s1730_s1, 16, %s2983_s4, [#allocation4]  }
 0x186   :  { %2231 = dma.done.wait [#allocation4], 16  }
 0x187   :  { %2232 = vsyncadd [#allocation4], 4294967280 }
 0x188   :  { %1736 = vsyncpa [#allocation4], 1 }

</bundles_post_ra>
